<compile_context>
chip_gen: v7x
topology: tpu7x:2x2x1
jax: 0.10.0
libtpu: 0.0.40
codegen_flags: <defaults>
</compile_context>

<pallas_src>
import functools
import numpy as np
import jax
import jax.numpy as jnp
from jax.experimental import pallas as pl
from jax.experimental.pallas import tpu as pltpu


# ----------------------------------------------------------------------------
# Kernel 1: fused backbone + classifier, tiled over pixels.
# Layout inside the kernel is (channels, pixels): the pixel tile T is the lane
# dimension, so every load/store is lane-dense and the tiny weights stay
# resident in VMEM across the whole grid (constant index maps).
#   feat   = relu(WconvT @ patches + bconv)        (Cf, T)
#   v      = WprojT @ feat + bproj                 (E,  T)
#   logits = scale * emb @ v                       (K,  T)
# ----------------------------------------------------------------------------
def _fused_backbone_classifier_kernel(p_ref, wc_ref, bc_ref, wp_ref, bp_ref,
                                      emb_ref, scale_ref, v_ref, logit_ref):
    p = p_ref[0]                                                        # (Kd, T)
    feat = jnp.dot(wc_ref[...], p, preferred_element_type=jnp.float32)  # (Cf, T)
    feat = jnp.maximum(feat + bc_ref[...], 0.0)
    v = jnp.dot(wp_ref[...], feat, preferred_element_type=jnp.float32) + bp_ref[...]
    v_ref[0] = v                                                        # (E, T)
    logit_ref[0] = scale_ref[0, 0] * jnp.dot(
        emb_ref[...], v, preferred_element_type=jnp.float32)            # (K, T)


def _pick_tile_hw(hw, max_tile=2048):
    # Full extent if it fits, otherwise a multiple of 128 (lane-aligned).
    return hw if hw <= max_tile else max_tile


def fused_backbone_classifier(patches, w_conv, b_conv, w_proj, b_proj, emb, scale):
    N, Kd, HW = patches.shape
    Cf = w_conv.shape[1]
    E = w_proj.shape[1]
    K = emb.shape[0]
    T = _pick_tile_hw(HW)
    grid = (N, pl.cdiv(HW, T))

    v_flat, logit_flat = pl.pallas_call(
        _fused_backbone_classifier_kernel,
        out_shape=(
            jax.ShapeDtypeStruct((N, E, HW), jnp.float32),
            jax.ShapeDtypeStruct((N, K, HW), jnp.float32),
        ),
        grid=grid,
        in_specs=[
            pl.BlockSpec((1, Kd, T), lambda n, i: (n, 0, i)),   # pixel tiles
            pl.BlockSpec((Cf, Kd), lambda n, i: (0, 0)),        # resident weights
            pl.BlockSpec((Cf, 1), lambda n, i: (0, 0)),
            pl.BlockSpec((E, Cf), lambda n, i: (0, 0)),
            pl.BlockSpec((E, 1), lambda n, i: (0, 0)),
            pl.BlockSpec((K, E), lambda n, i: (0, 0)),
            pl.BlockSpec(memory_space=pltpu.MemorySpace.SMEM),  # scale scalar
        ],
        out_specs=(
            pl.BlockSpec((1, E, T), lambda n, i: (n, 0, i)),
            pl.BlockSpec((1, K, T), lambda n, i: (n, 0, i)),
        ),
        compiler_params=pltpu.CompilerParams(
            dimension_semantics=("parallel", "parallel"),
            vmem_limit_bytes=32 * 1024 * 1024,
        ),
    )(patches, w_conv.T, b_conv.reshape(Cf, 1),
      w_proj.T, b_proj.reshape(E, 1), emb, scale)
    return v_flat, logit_flat


# ----------------------------------------------------------------------------
# Kernel 2: bilinear upsample (align_corners=False) as two matmuls per channel,
# batched over BC channels per grid step to amortize per-step overhead.
# Consumes channel-major (N, K, h, w) directly -> no NHWC->NCHW transpose.
#   out[c] = Wh @ (x[c] @ WwT)
# ----------------------------------------------------------------------------
def _upsample_kernel(x_ref, wwT_ref, wh_ref, o_ref):
    bc = x_ref.shape[1]
    for c in range(bc):                      # static unroll over channel block
        xc = x_ref[0, c]                                                # (h, w)
        yw = jnp.dot(xc, wwT_ref[...], preferred_element_type=jnp.float32)   # (h, W)
        o_ref[0, c] = jnp.dot(wh_ref[...], yw,
                              preferred_element_type=jnp.float32)       # (H, W)


def _pick_bc(K, h, w, H, W, budget_bytes=8 * 1024 * 1024):
    # Double-buffered f32 in + out per channel; stay well under scoped VMEM
    # on every generation (16 MiB default on v5e, 32 MiB v6e/v7x).
    per_c = 2 * 4 * (h * w + H * W)
    bc = budget_bytes // max(per_c, 1)
    return int(max(1, min(K, bc, 32)))


def bilinear_upsample(logits_nkhw, wh, wwT):
    N, K, h, w = logits_nkhw.shape
    H = wh.shape[0]
    W = wwT.shape[1]
    BC = _pick_bc(K, h, w, H, W)
    return pl.pallas_call(
        _upsample_kernel,
        out_shape=jax.ShapeDtypeStruct((N, K, H, W), jnp.float32),
        grid=(N, pl.cdiv(K, BC)),
        in_specs=[
            pl.BlockSpec((1, BC, h, w), lambda n, kb: (n, kb, 0, 0)),
            pl.BlockSpec((w, W), lambda n, kb: (0, 0)),
            pl.BlockSpec((H, h), lambda n, kb: (0, 0)),
        ],
        out_specs=pl.BlockSpec((1, BC, H, W), lambda n, kb: (n, kb, 0, 0)),
        compiler_params=pltpu.CompilerParams(
            dimension_semantics=("parallel", "parallel"),
            vmem_limit_bytes=32 * 1024 * 1024,
        ),
    )(logits_nkhw, wwT, wh)


# ----------------------------------------------------------------------------
# Glue: im2col for 3x3 / stride-2 / pad-1 conv, emitted channel-major
# (N, C*9, h*w) so the fused kernel sees pixels on the lane dimension.
# TODO(synk): for large images, fold im2col into the fused kernel with manual
# strided DMA instead of materializing the 2.25x patches array in HBM.
# ----------------------------------------------------------------------------
def im2col_3x3_s2(x):
    N, C, H, W = x.shape
    h, w = H // 2, W // 2
    xp = jnp.pad(x, ((0, 0), (0, 0), (1, 1), (1, 1)))
    cols = [xp[:, :, di:di + H:2, dj:dj + W:2]
            for di in range(3) for dj in range(3)]          # each (N, C, h, w)
    p = jnp.stack(cols, axis=2)                             # (N, C, 9, h, w)
    p = p.reshape(N, C * 9, h * w)                          # (N, Kd, HW)
    return p, h, w


# Glue: PyTorch-equivalent bilinear interpolation matrix (align_corners=False),
# built once in numpy and cached per (out_size, in_size).
@functools.lru_cache(maxsize=None)
def bilinear_matrix(out_size, in_size):
    i = np.arange(out_size, dtype=np.float64)
    src = (i + 0.5) * (in_size / out_size) - 0.5
    src = np.clip(src, 0.0, in_size - 1)
    i0 = np.floor(src).astype(np.int64)
    i1 = np.minimum(i0 + 1, in_size - 1)
    w1 = src - i0
    w0 = 1.0 - w1
    m = np.zeros((out_size, in_size), np.float32)
    m[np.arange(out_size), i0] += w0.astype(np.float32)
    m[np.arange(out_size), i1] += w1.astype(np.float32)
    return m


# ----------------------------------------------------------------------------
# Full forward (mirrors _SimpleSegmentationModelEmb.forward)
# ----------------------------------------------------------------------------
def simple_segmentation_model_emb_forward(x, emb, params):
    # inference_backbone only wraps the backbone in no_grad; math is identical.
    N, C, H, W = x.shape
    assert H % 2 == 0 and W % 2 == 0, "synthetic stride-2 backbone expects even H, W"
    input_shape = (H, W)

    # --- backbone -> features['out'], classifier(features, emb) -> (logits, v, l)
    # (single fused pallas_call; feat never leaves VMEM)
    patches, h, w = im2col_3x3_s2(x)                        # (N, C*9, h*w)
    E = params["w_proj"].shape[1]
    K = emb.shape[0]
    v_flat, logit_flat = fused_backbone_classifier(
        patches, params["w_conv"], params["b_conv"],
        params["w_proj"], params["b_proj"], emb, params["scale"])

    v = v_flat.reshape(N, E, h, w)                          # NCHW, no transpose
    logits = logit_flat.reshape(N, K, h, w)                 # NCHW, no transpose
    l = params["scale"][0, 0]

    # --- F.interpolate(logits, size=input_shape, mode='bilinear',
    #                   align_corners=False)
    wh = jnp.asarray(bilinear_matrix(input_shape[0], h))        # (H, h)
    wwT = jnp.asarray(bilinear_matrix(input_shape[1], w).T)     # (w, W)
    out = bilinear_upsample(logits, wh, wwT)                    # (N, K, H, W)

    result = {"out": out}
    # TODO(synk): aux_classifier is None in this synthetic setup; the 'aux'
    # branch would reuse fused_backbone_classifier + bilinear_upsample identically.
    # TODO(synk): for v6e/v7x, bf16 patches/weights with f32 accumulation would
    # halve HBM traffic; kept f32 here to match the reference bit-for-bit.
    return result, v, l


if __name__ == "__main__":
    key = jax.random.PRNGKey(0)
    k_x, k_emb, k_wc, k_bc, k_wp, k_bp = jax.random.split(key, 6)

    N, C_in, H, W = 2, 4, 16, 16
    C_feat, E, K = 32, 16, 8

    x = jax.random.normal(k_x, (N, C_in, H, W), jnp.float32)
    emb = jax.random.normal(k_emb, (K, E), jnp.float32)

    params = {
        "w_conv": 0.1 * jax.random.normal(k_wc, (C_in * 9, C_feat), jnp.float32),
        "b_conv": 0.1 * jax.random.normal(k_bc, (C_feat,), jnp.float32),
        "w_proj": 0.1 * jax.random.normal(k_wp, (C_feat, E), jnp.float32),
        "b_proj": 0.1 * jax.random.normal(k_bp, (E,), jnp.float32),
        "scale": jnp.array([[10.0]], jnp.float32),
    }

    fwd = jax.jit(simple_segmentation_model_emb_forward)
    result, v, l = fwd(x, emb, params)
    jax.block_until_ready((result["out"], v, l))

    # --- plain-JAX reference check ---
    patches, h, w = im2col_3x3_s2(x)                         # (N, Kd, HW)
    feat_ref = jnp.maximum(
        jnp.einsum("kf,nkp->nfp", params["w_conv"], patches)
        + params["b_conv"][None, :, None], 0.0)              # (N, Cf, HW)
    v_ref = (jnp.einsum("fe,nfp->nep", params["w_proj"], feat_ref)
             + params["b_proj"][None, :, None])              # (N, E, HW)
    logit_ref = params["scale"][0, 0] * jnp.einsum("ce,nep->ncp", emb, v_ref)
    v_ref = v_ref.reshape(N, E, h, w)
    logit_ref = logit_ref.reshape(N, K, h, w)
    wh_ref = jnp.asarray(bilinear_matrix(H, h))
    wwT_ref = jnp.asarray(bilinear_matrix(W, w).T)
    out_ref = jnp.einsum("Hh,nkhw,wW->nkHW", wh_ref, logit_ref, wwT_ref)

    assert result["out"].shape == (N, K, H, W)
    assert v.shape == (N, E, h, w)
    np.testing.assert_allclose(np.asarray(result["out"]), np.asarray(out_ref),
                               rtol=1e-4, atol=1e-4)
    np.testing.assert_allclose(np.asarray(v), np.asarray(v_ref),
                               rtol=1e-4, atol=1e-4)
    np.testing.assert_allclose(float(l), 10.0, rtol=0, atol=0)
    print("KERNEL_OK")
</pallas_src>

<mosaic_0001>
module attributes {stable_mosaic.version = 11 : i64} {
  func.func @_fused_backbone_classifier_kernel(%arg0: i32, %arg1: i32, %arg2: memref<1x36x64xf32, #tpu.memory_space<vmem>>, %arg3: memref<32x36xf32, #tpu.memory_space<vmem>>, %arg4: memref<32x1xf32, #tpu.memory_space<vmem>>, %arg5: memref<16x32xf32, #tpu.memory_space<vmem>>, %arg6: memref<16x1xf32, #tpu.memory_space<vmem>>, %arg7: memref<8x16xf32, #tpu.memory_space<vmem>>, %arg8: memref<1x1xf32, #tpu.memory_space<smem>>, %arg9: memref<1x16x64xf32, #tpu.memory_space<vmem>>, %arg10: memref<1x8x64xf32, #tpu.memory_space<vmem>>) attributes {dimension_semantics = [#tpu.dimension_semantics<parallel>, #tpu.dimension_semantics<parallel>], iteration_bounds = array<i64: 2, 1>, scalar_prefetch = 0 : i64, scratch_operands = 0 : i64, tpu.core_type = #tpu.core_type<tc>, window_params = [{transform_indices = @transform_0, window_bounds = array<i64: 1, 36, 64>}, {pipeline_mode = #tpu.pipeline_mode<synchronous>, transform_indices = @transform_1, window_bounds = array<i64: 32, 36>}, {pipeline_mode = #tpu.pipeline_mode<synchronous>, transform_indices = @transform_2, window_bounds = array<i64: 32, 1>}, {pipeline_mode = #tpu.pipeline_mode<synchronous>, transform_indices = @transform_3, window_bounds = array<i64: 16, 32>}, {pipeline_mode = #tpu.pipeline_mode<synchronous>, transform_indices = @transform_4, window_bounds = array<i64: 16, 1>}, {pipeline_mode = #tpu.pipeline_mode<synchronous>, transform_indices = @transform_5, window_bounds = array<i64: 8, 16>}, {transform_indices = @transform_6, window_bounds = array<i64: 1, 1>}, {transform_indices = @transform_7, window_bounds = array<i64: 1, 16, 64>}, {transform_indices = @transform_8, window_bounds = array<i64: 1, 8, 64>}]} {
    %c0 = arith.constant 0 : index
    %c0_0 = arith.constant 0 : index
    %c0_1 = arith.constant 0 : index
    %0 = vector.load %arg2[%c0, %c0_0, %c0_1] : memref<1x36x64xf32, #tpu.memory_space<vmem>>, vector<1x36x64xf32>
    %1 = vector.shape_cast %0 : vector<1x36x64xf32> to vector<36x64xf32>
    %c0_2 = arith.constant 0 : index
    %c0_3 = arith.constant 0 : index
    %2 = vector.load %arg3[%c0_2, %c0_3] : memref<32x36xf32, #tpu.memory_space<vmem>>, vector<32x36xf32>
    %cst = arith.constant dense<0.000000e+00> : vector<32x64xf32>
    %3 = tpu.matmul %2, %1, %cst {dimension_numbers = #tpu.dot_dimension_numbers<[1], [0], [0], [1], [0, 0, 1, 1], [], []>} : vector<32x36xf32>, vector<36x64xf32>, vector<32x64xf32> -> vector<32x64xf32>
    %c0_4 = arith.constant 0 : index
    %c0_5 = arith.constant 0 : index
    %4 = vector.load %arg4[%c0_4, %c0_5] : memref<32x1xf32, #tpu.memory_space<vmem>>, vector<32x1xf32>
    %5 = vector.broadcast %4 : vector<32x1xf32> to vector<32x64xf32>
    %6 = arith.addf %3, %5 : vector<32x64xf32>
    %cst_6 = arith.constant 0.000000e+00 : f32
    %7 = vector.broadcast %cst_6 : f32 to vector<32x64xf32>
    %8 = arith.maximumf %6, %7 : vector<32x64xf32>
    %c0_7 = arith.constant 0 : index
    %c0_8 = arith.constant 0 : index
    %9 = vector.load %arg5[%c0_7, %c0_8] : memref<16x32xf32, #tpu.memory_space<vmem>>, vector<16x32xf32>
    %cst_9 = arith.constant dense<0.000000e+00> : vector<16x64xf32>
    %10 = tpu.matmul %9, %8, %cst_9 {dimension_numbers = #tpu.dot_dimension_numbers<[1], [0], [0], [1], [0, 0, 1, 1], [], []>} : vector<16x32xf32>, vector<32x64xf32>, vector<16x64xf32> -> vector<16x64xf32>
    %c0_10 = arith.constant 0 : index
    %c0_11 = arith.constant 0 : index
    %11 = vector.load %arg6[%c0_10, %c0_11] : memref<16x1xf32, #tpu.memory_space<vmem>>, vector<16x1xf32>
    %12 = vector.broadcast %11 : vector<16x1xf32> to vector<16x64xf32>
    %13 = arith.addf %10, %12 : vector<16x64xf32>
    %c0_12 = arith.constant 0 : index
    %c0_13 = arith.constant 0 : index
    %c0_14 = arith.constant 0 : index
    %14 = vector.load %arg9[%c0_12, %c0_13, %c0_14] : memref<1x16x64xf32, #tpu.memory_space<vmem>>, vector<1x16x64xf32>
    %15 = vector.shape_cast %14 : vector<1x16x64xf32> to vector<16x64xf32>
    %16 = vector.shape_cast %13 : vector<16x64xf32> to vector<1x16x64xf32>
    tpu.vector_store %arg9[%c0_12, %c0_13, %c0_14], %16 {strides = array<i32>} : memref<1x16x64xf32, #tpu.memory_space<vmem>>, vector<1x16x64xf32>,
    %c0_15 = arith.constant 0 : index
    %c0_16 = arith.constant 0 : index
    %17 = memref.load %arg8[%c0_15, %c0_16] : memref<1x1xf32, #tpu.memory_space<smem>>
    %c0_17 = arith.constant 0 : index
    %c0_18 = arith.constant 0 : index
    %18 = vector.load %arg7[%c0_17, %c0_18] : memref<8x16xf32, #tpu.memory_space<vmem>>, vector<8x16xf32>
    %cst_19 = arith.constant dense<0.000000e+00> : vector<8x64xf32>
    %19 = tpu.matmul %18, %13, %cst_19 {dimension_numbers = #tpu.dot_dimension_numbers<[1], [0], [0], [1], [0, 0, 1, 1], [], []>} : vector<8x16xf32>, vector<16x64xf32>, vector<8x64xf32> -> vector<8x64xf32>
    %20 = vector.broadcast %17 : f32 to vector<8x64xf32>
    %21 = arith.mulf %20, %19 : vector<8x64xf32>
    %c0_20 = arith.constant 0 : index
    %c0_21 = arith.constant 0 : index
    %c0_22 = arith.constant 0 : index
    %22 = vector.load %arg10[%c0_20, %c0_21, %c0_22] : memref<1x8x64xf32, #tpu.memory_space<vmem>>, vector<1x8x64xf32>
    %23 = vector.shape_cast %22 : vector<1x8x64xf32> to vector<8x64xf32>
    %24 = vector.shape_cast %21 : vector<8x64xf32> to vector<1x8x64xf32>
    tpu.vector_store %arg10[%c0_20, %c0_21, %c0_22], %24 {strides = array<i32>} : memref<1x8x64xf32, #tpu.memory_space<vmem>>, vector<1x8x64xf32>,
    return
  }
  func.func @transform_0(%arg0: i32, %arg1: i32) -> (i32, i32, i32) {
    %c0_i32 = arith.constant 0 : i32
    %c0_i32_0 = arith.constant 0 : i32
    return %arg0, %c0_i32, %arg1 : i32, i32, i32
  }
  func.func @transform_1(%arg0: i32, %arg1: i32) -> (i32, i32) {
    %c0_i32 = arith.constant 0 : i32
    %c0_i32_0 = arith.constant 0 : i32
    %c0_i32_1 = arith.constant 0 : i32
    return %c0_i32, %c0_i32_0 : i32, i32
  }
  func.func @transform_2(%arg0: i32, %arg1: i32) -> (i32, i32) {
    %c0_i32 = arith.constant 0 : i32
    %c0_i32_0 = arith.constant 0 : i32
    %c0_i32_1 = arith.constant 0 : i32
    return %c0_i32, %c0_i32_0 : i32, i32
  }
  func.func @transform_3(%arg0: i32, %arg1: i32) -> (i32, i32) {
    %c0_i32 = arith.constant 0 : i32
    %c0_i32_0 = arith.constant 0 : i32
    %c0_i32_1 = arith.constant 0 : i32
    return %c0_i32, %c0_i32_0 : i32, i32
  }
  func.func @transform_4(%arg0: i32, %arg1: i32) -> (i32, i32) {
    %c0_i32 = arith.constant 0 : i32
    %c0_i32_0 = arith.constant 0 : i32
    %c0_i32_1 = arith.constant 0 : i32
    return %c0_i32, %c0_i32_0 : i32, i32
  }
  func.func @transform_5(%arg0: i32, %arg1: i32) -> (i32, i32) {
    %c0_i32 = arith.constant 0 : i32
    %c0_i32_0 = arith.constant 0 : i32
    %c0_i32_1 = arith.constant 0 : i32
    return %c0_i32, %c0_i32_0 : i32, i32
  }
  func.func @transform_6(%arg0: i32, %arg1: i32) -> (i32, i32) {
    %c0_i32 = arith.constant 0 : i32
    %c0_i32_0 = arith.constant 0 : i32
    %c0_i32_1 = arith.constant 0 : i32
    return %c0_i32, %c0_i32_0 : i32, i32
  }
  func.func @transform_7(%arg0: i32, %arg1: i32) -> (i32, i32, i32) {
    %c0_i32 = arith.constant 0 : i32
    %c0_i32_0 = arith.constant 0 : i32
    return %arg0, %c0_i32, %arg1 : i32, i32, i32
  }
  func.func @transform_8(%arg0: i32, %arg1: i32) -> (i32, i32, i32) {
    %c0_i32 = arith.constant 0 : i32
    %c0_i32_0 = arith.constant 0 : i32
    return %arg0, %c0_i32, %arg1 : i32, i32, i32
  }
}

module attributes {stable_mosaic.version = 11 : i64} {
  func.func @_upsample_kernel(%arg0: i32, %arg1: i32, %arg2: memref<1x8x8x8xf32, #tpu.memory_space<vmem>>, %arg3: memref<8x16xf32, #tpu.memory_space<vmem>>, %arg4: memref<16x8xf32, #tpu.memory_space<vmem>>, %arg5: memref<1x8x16x16xf32, #tpu.memory_space<vmem>>) attributes {dimension_semantics = [#tpu.dimension_semantics<parallel>, #tpu.dimension_semantics<parallel>], iteration_bounds = array<i64: 2, 1>, scalar_prefetch = 0 : i64, scratch_operands = 0 : i64, tpu.core_type = #tpu.core_type<tc>, window_params = [{transform_indices = @transform_0, window_bounds = array<i64: 1, 8, 8, 8>}, {pipeline_mode = #tpu.pipeline_mode<synchronous>, transform_indices = @transform_1, window_bounds = array<i64: 8, 16>}, {pipeline_mode = #tpu.pipeline_mode<synchronous>, transform_indices = @transform_2, window_bounds = array<i64: 16, 8>}, {transform_indices = @transform_3, window_bounds = array<i64: 1, 8, 16, 16>}]} {
    %c0 = arith.constant 0 : index
    %c0_0 = arith.constant 0 : index
    %c0_1 = arith.constant 0 : index
    %c0_2 = arith.constant 0 : index
    %0 = vector.load %arg2[%c0, %c0_0, %c0_1, %c0_2] : memref<1x8x8x8xf32, #tpu.memory_space<vmem>>, vector<1x1x8x8xf32>
    %1 = vector.shape_cast %0 : vector<1x1x8x8xf32> to vector<8x8xf32>
    %c0_3 = arith.constant 0 : index
    %c0_4 = arith.constant 0 : index
    %2 = vector.load %arg3[%c0_3, %c0_4] : memref<8x16xf32, #tpu.memory_space<vmem>>, vector<8x16xf32>
    %cst = arith.constant dense<0.000000e+00> : vector<8x16xf32>
    %3 = tpu.matmul %1, %2, %cst {dimension_numbers = #tpu.dot_dimension_numbers<[1], [0], [0], [1], [0, 0, 1, 1], [], []>} : vector<8x8xf32>, vector<8x16xf32>, vector<8x16xf32> -> vector<8x16xf32>
    %c0_5 = arith.constant 0 : index
    %c0_6 = arith.constant 0 : index
    %4 = vector.load %arg4[%c0_5, %c0_6] : memref<16x8xf32, #tpu.memory_space<vmem>>, vector<16x8xf32>
    %cst_7 = arith.constant dense<0.000000e+00> : vector<16x16xf32>
    %5 = tpu.matmul %4, %3, %cst_7 {dimension_numbers = #tpu.dot_dimension_numbers<[1], [0], [0], [1], [0, 0, 1, 1], [], []>} : vector<16x8xf32>, vector<8x16xf32>, vector<16x16xf32> -> vector<16x16xf32>
    %c0_8 = arith.constant 0 : index
    %c0_9 = arith.constant 0 : index
    %c0_10 = arith.constant 0 : index
    %c0_11 = arith.constant 0 : index
    %6 = vector.load %arg5[%c0_8, %c0_9, %c0_10, %c0_11] : memref<1x8x16x16xf32, #tpu.memory_space<vmem>>, vector<1x1x16x16xf32>
    %7 = vector.shape_cast %6 : vector<1x1x16x16xf32> to vector<16x16xf32>
    %8 = vector.shape_cast %5 : vector<16x16xf32> to vector<1x1x16x16xf32>
    tpu.vector_store %arg5[%c0_8, %c0_9, %c0_10, %c0_11], %8 {strides = array<i32>} : memref<1x8x16x16xf32, #tpu.memory_space<vmem>>, vector<1x1x16x16xf32>,
    %c0_12 = arith.constant 0 : index
    %c1 = arith.constant 1 : index
    %c0_13 = arith.constant 0 : index
    %c0_14 = arith.constant 0 : index
    %9 = vector.load %arg2[%c0_12, %c1, %c0_13, %c0_14] : memref<1x8x8x8xf32, #tpu.memory_space<vmem>>, vector<1x1x8x8xf32>
    %10 = vector.shape_cast %9 : vector<1x1x8x8xf32> to vector<8x8xf32>
    %c0_15 = arith.constant 0 : index
    %c0_16 = arith.constant 0 : index
    %11 = vector.load %arg3[%c0_15, %c0_16] : memref<8x16xf32, #tpu.memory_space<vmem>>, vector<8x16xf32>
    %cst_17 = arith.constant dense<0.000000e+00> : vector<8x16xf32>
    %12 = tpu.matmul %10, %11, %cst_17 {dimension_numbers = #tpu.dot_dimension_numbers<[1], [0], [0], [1], [0, 0, 1, 1], [], []>} : vector<8x8xf32>, vector<8x16xf32>, vector<8x16xf32> -> vector<8x16xf32>
    %c0_18 = arith.constant 0 : index
    %c0_19 = arith.constant 0 : index
    %13 = vector.load %arg4[%c0_18, %c0_19] : memref<16x8xf32, #tpu.memory_space<vmem>>, vector<16x8xf32>
    %cst_20 = arith.constant dense<0.000000e+00> : vector<16x16xf32>
    %14 = tpu.matmul %13, %12, %cst_20 {dimension_numbers = #tpu.dot_dimension_numbers<[1], [0], [0], [1], [0, 0, 1, 1], [], []>} : vector<16x8xf32>, vector<8x16xf32>, vector<16x16xf32> -> vector<16x16xf32>
    %c0_21 = arith.constant 0 : index
    %c1_22 = arith.constant 1 : index
    %c0_23 = arith.constant 0 : index
    %c0_24 = arith.constant 0 : index
    %15 = vector.load %arg5[%c0_21, %c1_22, %c0_23, %c0_24] : memref<1x8x16x16xf32, #tpu.memory_space<vmem>>, vector<1x1x16x16xf32>
    %16 = vector.shape_cast %15 : vector<1x1x16x16xf32> to vector<16x16xf32>
    %17 = vector.shape_cast %14 : vector<16x16xf32> to vector<1x1x16x16xf32>
    tpu.vector_store %arg5[%c0_21, %c1_22, %c0_23, %c0_24], %17 {strides = array<i32>} : memref<1x8x16x16xf32, #tpu.memory_space<vmem>>, vector<1x1x16x16xf32>,
    %c0_25 = arith.constant 0 : index
    %c2 = arith.constant 2 : index
    %c0_26 = arith.constant 0 : index
    %c0_27 = arith.constant 0 : index
    %18 = vector.load %arg2[%c0_25, %c2, %c0_26, %c0_27] : memref<1x8x8x8xf32, #tpu.memory_space<vmem>>, vector<1x1x8x8xf32>
    %19 = vector.shape_cast %18 : vector<1x1x8x8xf32> to vector<8x8xf32>
    %c0_28 = arith.constant 0 : index
    %c0_29 = arith.constant 0 : index
    %20 = vector.load %arg3[%c0_28, %c0_29] : memref<8x16xf32, #tpu.memory_space<vmem>>, vector<8x16xf32>
    %cst_30 = arith.constant dense<0.000000e+00> : vector<8x16xf32>
    %21 = tpu.matmul %19, %20, %cst_30 {dimension_numbers = #tpu.dot_dimension_numbers<[1], [0], [0], [1], [0, 0, 1, 1], [], []>} : vector<8x8xf32>, vector<8x16xf32>, vector<8x16xf32> -> vector<8x16xf32>
    %c0_31 = arith.constant 0 : index
    %c0_32 = arith.constant 0 : index
    %22 = vector.load %arg4[%c0_31, %c0_32] : memref<16x8xf32, #tpu.memory_space<vmem>>, vector<16x8xf32>
    %cst_33 = arith.constant dense<0.000000e+00> : vector<16x16xf32>
    %23 = tpu.matmul %22, %21, %cst_33 {dimension_numbers = #tpu.dot_dimension_numbers<[1], [0], [0], [1], [0, 0, 1, 1], [], []>} : vector<16x8xf32>, vector<8x16xf32>, vector<16x16xf32> -> vector<16x16xf32>
    %c0_34 = arith.constant 0 : index
    %c2_35 = arith.constant 2 : index
    %c0_36 = arith.constant 0 : index
    %c0_37 = arith.constant 0 : index
    %24 = vector.load %arg5[%c0_34, %c2_35, %c0_36, %c0_37] : memref<1x8x16x16xf32, #tpu.memory_space<vmem>>, vector<1x1x16x16xf32>
    %25 = vector.shape_cast %24 : vector<1x1x16x16xf32> to vector<16x16xf32>
    %26 = vector.shape_cast %23 : vector<16x16xf32> to vector<1x1x16x16xf32>
    tpu.vector_store %arg5[%c0_34, %c2_35, %c0_36, %c0_37], %26 {strides = array<i32>} : memref<1x8x16x16xf32, #tpu.memory_space<vmem>>, vector<1x1x16x16xf32>,
    %c0_38 = arith.constant 0 : index
    %c3 = arith.constant 3 : index
    %c0_39 = arith.constant 0 : index
    %c0_40 = arith.constant 0 : index
    %27 = vector.load %arg2[%c0_38, %c3, %c0_39, %c0_40] : memref<1x8x8x8xf32, #tpu.memory_space<vmem>>, vector<1x1x8x8xf32>
    %28 = vector.shape_cast %27 : vector<1x1x8x8xf32> to vector<8x8xf32>
    %c0_41 = arith.constant 0 : index
    %c0_42 = arith.constant 0 : index
    %29 = vector.load %arg3[%c0_41, %c0_42] : memref<8x16xf32, #tpu.memory_space<vmem>>, vector<8x16xf32>
    %cst_43 = arith.constant dense<0.000000e+00> : vector<8x16xf32>
    %30 = tpu.matmul %28, %29, %cst_43 {dimension_numbers = #tpu.dot_dimension_numbers<[1], [0], [0], [1], [0, 0, 1, 1], [], []>} : vector<8x8xf32>, vector<8x16xf32>, vector<8x16xf32> -> vector<8x16xf32>
    %c0_44 = arith.constant 0 : index
    %c0_45 = arith.constant 0 : index
    %31 = vector.load %arg4[%c0_44, %c0_45] : memref<16x8xf32, #tpu.memory_space<vmem>>, vector<16x8xf32>
    %cst_46 = arith.constant dense<0.000000e+00> : vector<16x16xf32>
    %32 = tpu.matmul %31, %30, %cst_46 {dimension_numbers = #tpu.dot_dimension_numbers<[1], [0], [0], [1], [0, 0, 1, 1], [], []>} : vector<16x8xf32>, vector<8x16xf32>, vector<16x16xf32> -> vector<16x16xf32>
    %c0_47 = arith.constant 0 : index
    %c3_48 = arith.constant 3 : index
    %c0_49 = arith.constant 0 : index
    %c0_50 = arith.constant 0 : index
    %33 = vector.load %arg5[%c0_47, %c3_48, %c0_49, %c0_50] : memref<1x8x16x16xf32, #tpu.memory_space<vmem>>, vector<1x1x16x16xf32>
    %34 = vector.shape_cast %33 : vector<1x1x16x16xf32> to vector<16x16xf32>
    %35 = vector.shape_cast %32 : vector<16x16xf32> to vector<1x1x16x16xf32>
    tpu.vector_store %arg5[%c0_47, %c3_48, %c0_49, %c0_50], %35 {strides = array<i32>} : memref<1x8x16x16xf32, #tpu.memory_space<vmem>>, vector<1x1x16x16xf32>,
    %c0_51 = arith.constant 0 : index
    %c4 = arith.constant 4 : index
    %c0_52 = arith.constant 0 : index
    %c0_53 = arith.constant 0 : index
    %36 = vector.load %arg2[%c0_51, %c4, %c0_52, %c0_53] : memref<1x8x8x8xf32, #tpu.memory_space<vmem>>, vector<1x1x8x8xf32>
    %37 = vector.shape_cast %36 : vector<1x1x8x8xf32> to vector<8x8xf32>
    %c0_54 = arith.constant 0 : index
    %c0_55 = arith.constant 0 : index
    %38 = vector.load %arg3[%c0_54, %c0_55] : memref<8x16xf32, #tpu.memory_space<vmem>>, vector<8x16xf32>
    %cst_56 = arith.constant dense<0.000000e+00> : vector<8x16xf32>
    %39 = tpu.matmul %37, %38, %cst_56 {dimension_numbers = #tpu.dot_dimension_numbers<[1], [0], [0], [1], [0, 0, 1, 1], [], []>} : vector<8x8xf32>, vector<8x16xf32>, vector<8x16xf32> -> vector<8x16xf32>
    %c0_57 = arith.constant 0 : index
    %c0_58 = arith.constant 0 : index
    %40 = vector.load %arg4[%c0_57, %c0_58] : memref<16x8xf32, #tpu.memory_space<vmem>>, vector<16x8xf32>
    %cst_59 = arith.constant dense<0.000000e+00> : vector<16x16xf32>
    %41 = tpu.matmul %40, %39, %cst_59 {dimension_numbers = #tpu.dot_dimension_numbers<[1], [0], [0], [1], [0, 0, 1, 1], [], []>} : vector<16x8xf32>, vector<8x16xf32>, vector<16x16xf32> -> vector<16x16xf32>
    %c0_60 = arith.constant 0 : index
    %c4_61 = arith.constant 4 : index
    %c0_62 = arith.constant 0 : index
    %c0_63 = arith.constant 0 : index
    %42 = vector.load %arg5[%c0_60, %c4_61, %c0_62, %c0_63] : memref<1x8x16x16xf32, #tpu.memory_space<vmem>>, vector<1x1x16x16xf32>
    %43 = vector.shape_cast %42 : vector<1x1x16x16xf32> to vector<16x16xf32>
    %44 = vector.shape_cast %41 : vector<16x16xf32> to vector<1x1x16x16xf32>
    tpu.vector_store %arg5[%c0_60, %c4_61, %c0_62, %c0_63], %44 {strides = array<i32>} : memref<1x8x16x16xf32, #tpu.memory_space<vmem>>, vector<1x1x16x16xf32>,
    %c0_64 = arith.constant 0 : index
    %c5 = arith.constant 5 : index
    %c0_65 = arith.constant 0 : index
    %c0_66 = arith.constant 0 : index
    %45 = vector.load %arg2[%c0_64, %c5, %c0_65, %c0_66] : memref<1x8x8x8xf32, #tpu.memory_space<vmem>>, vector<1x1x8x8xf32>
    %46 = vector.shape_cast %45 : vector<1x1x8x8xf32> to vector<8x8xf32>
    %c0_67 = arith.constant 0 : index
    %c0_68 = arith.constant 0 : index
    %47 = vector.load %arg3[%c0_67, %c0_68] : memref<8x16xf32, #tpu.memory_space<vmem>>, vector<8x16xf32>
    %cst_69 = arith.constant dense<0.000000e+00> : vector<8x16xf32>
    %48 = tpu.matmul %46, %47, %cst_69 {dimension_numbers = #tpu.dot_dimension_numbers<[1], [0], [0], [1], [0, 0, 1, 1], [], []>} : vector<8x8xf32>, vector<8x16xf32>, vector<8x16xf32> -> vector<8x16xf32>
    %c0_70 = arith.constant 0 : index
    %c0_71 = arith.constant 0 : index
    %49 = vector.load %arg4[%c0_70, %c0_71] : memref<16x8xf32, #tpu.memory_space<vmem>>, vector<16x8xf32>
    %cst_72 = arith.constant dense<0.000000e+00> : vector<16x16xf32>
    %50 = tpu.matmul %49, %48, %cst_72 {dimension_numbers = #tpu.dot_dimension_numbers<[1], [0], [0], [1], [0, 0, 1, 1], [], []>} : vector<16x8xf32>, vector<8x16xf32>, vector<16x16xf32> -> vector<16x16xf32>
    %c0_73 = arith.constant 0 : index
    %c5_74 = arith.constant 5 : index
    %c0_75 = arith.constant 0 : index
    %c0_76 = arith.constant 0 : index
    %51 = vector.load %arg5[%c0_73, %c5_74, %c0_75, %c0_76] : memref<1x8x16x16xf32, #tpu.memory_space<vmem>>, vector<1x1x16x16xf32>
    %52 = vector.shape_cast %51 : vector<1x1x16x16xf32> to vector<16x16xf32>
    %53 = vector.shape_cast %50 : vector<16x16xf32> to vector<1x1x16x16xf32>
    tpu.vector_store %arg5[%c0_73, %c5_74, %c0_75, %c0_76], %53 {strides = array<i32>} : memref<1x8x16x16xf32, #tpu.memory_space<vmem>>, vector<1x1x16x16xf32>,
    %c0_77 = arith.constant 0 : index
    %c6 = arith.constant 6 : index
    %c0_78 = arith.constant 0 : index
    %c0_79 = arith.constant 0 : index
    %54 = vector.load %arg2[%c0_77, %c6, %c0_78, %c0_79] : memref<1x8x8x8xf32, #tpu.memory_space<vmem>>, vector<1x1x8x8xf32>
    %55 = vector.shape_cast %54 : vector<1x1x8x8xf32> to vector<8x8xf32>
    %c0_80 = arith.constant 0 : index
    %c0_81 = arith.constant 0 : index
    %56 = vector.load %arg3[%c0_80, %c0_81] : memref<8x16xf32, #tpu.memory_space<vmem>>, vector<8x16xf32>
    %cst_82 = arith.constant dense<0.000000e+00> : vector<8x16xf32>
    %57 = tpu.matmul %55, %56, %cst_82 {dimension_numbers = #tpu.dot_dimension_numbers<[1], [0], [0], [1], [0, 0, 1, 1], [], []>} : vector<8x8xf32>, vector<8x16xf32>, vector<8x16xf32> -> vector<8x16xf32>
    %c0_83 = arith.constant 0 : index
    %c0_84 = arith.constant 0 : index
    %58 = vector.load %arg4[%c0_83, %c0_84] : memref<16x8xf32, #tpu.memory_space<vmem>>, vector<16x8xf32>
    %cst_85 = arith.constant dense<0.000000e+00> : vector<16x16xf32>
    %59 = tpu.matmul %58, %57, %cst_85 {dimension_numbers = #tpu.dot_dimension_numbers<[1], [0], [0], [1], [0, 0, 1, 1], [], []>} : vector<16x8xf32>, vector<8x16xf32>, vector<16x16xf32> -> vector<16x16xf32>
    %c0_86 = arith.constant 0 : index
    %c6_87 = arith.constant 6 : index
    %c0_88 = arith.constant 0 : index
    %c0_89 = arith.constant 0 : index
    %60 = vector.load %arg5[%c0_86, %c6_87, %c0_88, %c0_89] : memref<1x8x16x16xf32, #tpu.memory_space<vmem>>, vector<1x1x16x16xf32>
    %61 = vector.shape_cast %60 : vector<1x1x16x16xf32> to vector<16x16xf32>
    %62 = vector.shape_cast %59 : vector<16x16xf32> to vector<1x1x16x16xf32>
    tpu.vector_store %arg5[%c0_86, %c6_87, %c0_88, %c0_89], %62 {strides = array<i32>} : memref<1x8x16x16xf32, #tpu.memory_space<vmem>>, vector<1x1x16x16xf32>,
    %c0_90 = arith.constant 0 : index
    %c7 = arith.constant 7 : index
    %c0_91 = arith.constant 0 : index
    %c0_92 = arith.constant 0 : index
    %63 = vector.load %arg2[%c0_90, %c7, %c0_91, %c0_92] : memref<1x8x8x8xf32, #tpu.memory_space<vmem>>, vector<1x1x8x8xf32>
    %64 = vector.shape_cast %63 : vector<1x1x8x8xf32> to vector<8x8xf32>
    %c0_93 = arith.constant 0 : index
    %c0_94 = arith.constant 0 : index
    %65 = vector.load %arg3[%c0_93, %c0_94] : memref<8x16xf32, #tpu.memory_space<vmem>>, vector<8x16xf32>
    %cst_95 = arith.constant dense<0.000000e+00> : vector<8x16xf32>
    %66 = tpu.matmul %64, %65, %cst_95 {dimension_numbers = #tpu.dot_dimension_numbers<[1], [0], [0], [1], [0, 0, 1, 1], [], []>} : vector<8x8xf32>, vector<8x16xf32>, vector<8x16xf32> -> vector<8x16xf32>
    %c0_96 = arith.constant 0 : index
    %c0_97 = arith.constant 0 : index
    %67 = vector.load %arg4[%c0_96, %c0_97] : memref<16x8xf32, #tpu.memory_space<vmem>>, vector<16x8xf32>
    %cst_98 = arith.constant dense<0.000000e+00> : vector<16x16xf32>
    %68 = tpu.matmul %67, %66, %cst_98 {dimension_numbers = #tpu.dot_dimension_numbers<[1], [0], [0], [1], [0, 0, 1, 1], [], []>} : vector<16x8xf32>, vector<8x16xf32>, vector<16x16xf32> -> vector<16x16xf32>
    %c0_99 = arith.constant 0 : index
    %c7_100 = arith.constant 7 : index
    %c0_101 = arith.constant 0 : index
    %c0_102 = arith.constant 0 : index
    %69 = vector.load %arg5[%c0_99, %c7_100, %c0_101, %c0_102] : memref<1x8x16x16xf32, #tpu.memory_space<vmem>>, vector<1x1x16x16xf32>
    %70 = vector.shape_cast %69 : vector<1x1x16x16xf32> to vector<16x16xf32>
    %71 = vector.shape_cast %68 : vector<16x16xf32> to vector<1x1x16x16xf32>
    tpu.vector_store %arg5[%c0_99, %c7_100, %c0_101, %c0_102], %71 {strides = array<i32>} : memref<1x8x16x16xf32, #tpu.memory_space<vmem>>, vector<1x1x16x16xf32>,
    return
  }
  func.func @transform_0(%arg0: i32, %arg1: i32) -> (i32, i32, i32, i32) {
    %c0_i32 = arith.constant 0 : i32
    %c0_i32_0 = arith.constant 0 : i32
    %c0_i32_1 = arith.constant 0 : i32
    return %arg0, %arg1, %c0_i32, %c0_i32_0 : i32, i32, i32, i32
  }
  func.func @transform_1(%arg0: i32, %arg1: i32) -> (i32, i32) {
    %c0_i32 = arith.constant 0 : i32
    %c0_i32_0 = arith.constant 0 : i32
    %c0_i32_1 = arith.constant 0 : i32
    return %c0_i32, %c0_i32_0 : i32, i32
  }
  func.func @transform_2(%arg0: i32, %arg1: i32) -> (i32, i32) {
    %c0_i32 = arith.constant 0 : i32
    %c0_i32_0 = arith.constant 0 : i32
    %c0_i32_1 = arith.constant 0 : i32
    return %c0_i32, %c0_i32_0 : i32, i32
  }
  func.func @transform_3(%arg0: i32, %arg1: i32) -> (i32, i32, i32, i32) {
    %c0_i32 = arith.constant 0 : i32
    %c0_i32_0 = arith.constant 0 : i32
    %c0_i32_1 = arith.constant 0 : i32
    return %arg0, %arg1, %c0_i32, %c0_i32_0 : i32, i32, i32, i32
  }
}

</mosaic_0001>

<bundles_post_ra>
// kernel: simple_segmentation_model_emb_forward.2
= control target key start
LH: loop header
LB: loop body
LE: loop exit
PB: predicated region body
PF: predicated region fallthrough
CT: control target
= control target key end

     0   :  { %s996_s29 = smov 0   ;;  %s998_s30 = smov 0   ;;  %s1085_s0 = inlined_call_operand.vmem [shape: f32[2,36,64], index: 0, kind: input, shape index: {}]   ;;  %s1086_s1 = inlined_call_operand.vmem [shape: f32[32,36], index: 1, kind: input, shape index: {}]   ;;  %s1087_s2 = inlined_call_operand.vmem [shape: f32[32,1], index: 2, kind: input, shape index: {}]   ;;  %s1088_s3 = inlined_call_operand.vmem [shape: f32[16,32], index: 3, kind: input, shape index: {}]   ;;  %s1089_s4 = inlined_call_operand.vmem [shape: f32[16,1], index: 4, kind: input, shape index: {}]   ;;  %s1090_s5 = inlined_call_operand.vmem [shape: f32[8,16], index: 5, kind: input, shape index: {}]   ;;  %s1091_s6 = inlined_call_operand.<no memory space> [shape: f32[1,1], index: 6, kind: input, shape index: {}]   ;;  %s1092_s7 = inlined_call_operand.vmem [shape: f32[2,16,64], index: 7, kind: output, shape index: {0}]   ;;  %s1093_s8 = inlined_call_operand.vmem [shape: f32[2,8,64], index: 8, kind: output, shape index: {1}]  }
   0x1   :  { %14 = sst [smem:[#allocation2]] %s1091_s6  ;;  %s1000_s9 = smov 0  }
   0x2 LB: > { %s32_s6 = sadd.s32 1, %s938_s30  ;;  %p802_p0 = scmp.ge.s32.totalorder %s942_s9, 1  ;;  %s942_s9 = sphi %s1000_s9, %s20_s9   ;;  %s938_s30 = sphi %s998_s30, %s1095_s30   ;;  %s934_s29 = sphi %s996_s29, %s1094_s29  }
   0x3   : > { %p34_p1 = scmp.ge.s32.totalorder %s32_s6, 2  ;;  %p287_p2 = scmp.lt.s32.totalorder %s942_s9, 3 }
   0x5   : > { %s1097_s6 = smov (%p34_p1, %s32_s6), 0  ;;  %p288_p3 = pnand %p802_p0, %p287_p2 }
   0x6   : > { %p334_p4 = scmp.lt.s32.totalorder (!%p288_p3), %s934_s29, 1  ;;  %v362_v0 = vld [vmem:[%s1086_s1] sm:$0xff] (!%p288_p3)  ;;  %vm390_vm0 = vcmask (!%p288_p3), 293888   ;;  %v368_v2 = vld [vmem:[%s1087_s2 + $0x10] sm:$0xff] (!%p288_p3)  ;;  %v944_v3 = vmov (!%p288_p3), 0   ;;  %v367_v4 = vld [vmem:[%s1087_s2 + $0x8] sm:$0xff] (!%p288_p3) }
   0x7   : > { %291 = sbr.rel (%p288_p3) target bundleno = 693 (0x2b5), region = 48  ;;  %846 = vmatprep.mubr.msk.f32.mxu0 (!%p288_p3), %vm390_vm0, %v362_v0  ;;  %v366_v1 = vld [vmem:[%s1087_s2] sm:$0xff] (!%p288_p3)  ;;  %918 = vset.pattern.permute.xlu0 (!%p288_p3), %v944_v3  ;;  %v369_v5 = vld [vmem:[%s1087_s2 + $0x18] sm:$0xff] (!%p288_p3)  ;;  %v499_v13 = vld [vmem:[%s1089_s4 + $0x8] sm:$0xff] (!%p288_p3)  ;;  %vm403_vm1 = vcmask (!%p288_p3), 1043456   ;;  %vm510_vm2 = vcmask (!%p288_p3), 261120  }
   0x8   : > { %919 = vset.pattern.permute.xlu1 (!%p288_p3), %v944_v3  ;;  %372 = vperm.xlu0 (!%p288_p3), %918, %v366_v1   ;;  %v498_v11 = vld [vmem:[%s1089_s4] sm:$0xff] (!%p288_p3)  ;;  %v363_v15 = vld [vmem:[%s1086_s1 + $0x8] sm:$0xff] (!%p288_p3)  ;;  %v364_v16 = vld [vmem:[%s1086_s1 + $0x10] sm:$0xff] (!%p288_p3)  ;;  %v945_v38 = vmov (!%p288_p3), 0.0|0.0   ;;  %vm946_vm3 = vmmov (!%p288_p3), 0   ;;  %v947_v39 = vmov (!%p288_p3), 0.0  }
   0x9   : > { %382 = vperm.xlu1 (!%p288_p3), %919, %v368_v2   ;;  %v365_v17 = vld [vmem:[%s1086_s1 + $0x18] sm:$0xff] (!%p288_p3)  ;;  %v496_v18 = vld [vmem:[%s1088_s3] sm:$0xff] (!%p288_p3)  ;;  %v497_v37 = vld [vmem:[%s1088_s3 + $0x8] sm:$0xff] (!%p288_p3)  ;;  %vm592_vm4 = vcmask (!%p288_p3), 523264   ;;  %vm597_vm5 = vcmask (!%p288_p3), 130048   ;;  %s595_s25 = sld [smem:[#allocation2]] (!%p288_p3) }
   0xa   : > { %860 = vmatprep.mubr.msk.f32.mxu1 (!%p288_p3), %vm510_vm2, %v496_v18  ;;  %v596_v47 = vld [vmem:[%s1090_s5] sm:$0xff] (!%p288_p3) }
   0xc   : > { %377 = vperm.xlu0 (!%p288_p3), %918, %v367_v4  }
   0xd   : > { %387 = vperm.xlu1 (!%p288_p3), %919, %v369_v5  }
   0xe   : > { %s1099_s29 = smov (!%p334_p4, %s934_s29), 1 }
   0xf   : > { %s889_s16 = smul.u32 40, %s1099_s29  ;;  %s817_s19 = sshll.u32 %s1099_s29, 4  ;;  %v671_v48 = vstv %s595_s25 }
  0x10   : > { %502 = vperm.xlu0 %918, %v498_v11   ;;  %s349_s22 = scalar_lea.vmem %s1092_s7, %s817_s19  ;;  %s806_s26 = sshll.u32 %s1099_s29, 3 }
  0x11   : > { %s341_s23 = scalar_lea.vmem %s1085_s0, %s889_s16  ;;  %507 = vperm.xlu1 %919, %v499_v13   ;;  %s356_s10 = scalar_lea.vmem %s1093_s8, %s806_s26 }
  0x12   : > { %v357_v6 = vld [vmem:[%s341_s23] sm:$0xff]  ;;  %v358_v7 = vld [vmem:[%s341_s23 + $0x8] sm:$0xff]  ;;  %v359_v8 = vld [vmem:[%s341_s23 + $0x10] sm:$0xff] }
  0x13   : > { %v870_v9 = vpack.c.bf16 %v358_v7, %v357_v6  ;;  %v360_v10 = vld [vmem:[%s341_s23 + $0x18] sm:$0xff]  ;;  %v361_v14 = vld [vmem:[%s341_s23 + $0x20] sm:$0xf] }
  0x14   : > { %v874_v12 = vpack.c.bf16 %v360_v10, %v359_v8 }
  0x15   : > { %871 = vmatprep.subr.bf16.mxu0 %v870_v9 }
  0x16   : > { %873 = vmatpush3.bf16.msra.mxu0 %v870_v9 }
  0x17   : > { %875 = vmatprep.subr.bf16.mxu0 %v874_v12 }
  0x1a   : > { %877 = vmatpush3.bf16.msra.mxu0 %v874_v12 }
  0x1b   : > { %844 = vmatprep.subr.msk.mxu0 %vm403_vm1, %v361_v14 }
  0x1e   : > { %845 = vmatpush3.msk.msra.mxu0 %vm403_vm1, %v361_v14 }
  0x1f   : > { %847 = vmatmul.mubr.msk.f32.vlgmr.msra.gmra.mrb[0].mxu0 %vm390_vm0, %v363_v15 }
  0x20   : > { %849 = vmatprep.mubr.msk.f32.mxu0 %vm390_vm0, %v364_v16 }
  0x23   : > { %850 = vmatmul.mubr.msk.f32.gmra.mrb[2].mxu0 %vm390_vm0, %v365_v17 }
  0x87   : > { %v373_v19 = vpop.permute.xlu0 %372 }
  0x88   : > { %v383_v20 = vpop.permute.xlu1 %382 }
  0x8b   : > { %v378_v21 = vpop.permute.xlu0 %377 }
  0x8c   : > { %v388_v27 = vpop.permute.xlu1 %387 }
  0x8f   : > { %v503_v42 = vpop.permute.xlu0 %502 }
  0x90   : > { %v508_v40 = vpop.permute.xlu1 %507 }
  0xf2   : > { %v848_v22 = vpop.f32.mrb[0].mxu0 }
  0xf3   : > { %v479_v23 = vadd.f32 %v848_v22, %v378_v21  ;;  %v473_v24 = vpop.f32.mrb[1].mxu0 }
  0xf4   : > { %v474_v25 = vadd.f32 %v473_v24, %v373_v19 }
  0xf5   : > { %v493_v26 = vmax.f32 %v479_v23, 0.0 }
  0xf6   : > { %v492_v28 = vmax.f32 %v474_v25, 0.0  ;;  %v851_v29 = vpop.f32.mrb[2].mxu0 }
  0xf7   : > { %v489_v30 = vadd.f32 %v851_v29, %v388_v27  ;;  %v483_v31 = vpop.f32.mrb[3].mxu0 }
  0xf8   : > { %v484_v32 = vadd.f32 %v483_v31, %v383_v20  ;;  %v878_v33 = vpack.c.bf16 %v493_v26, %v492_v28 }
  0xf9   : > { %v495_v34 = vmax.f32 %v489_v30, 0.0 }
  0xfa   : > { %v494_v35 = vmax.f32 %v484_v32, 0.0  ;;  %879 = vmatprep.subr.bf16.mxu1 %v878_v33 }
  0xfb   : > { %881 = vmatpush3.bf16.msra.mxu1 %v878_v33 }
  0xfc   : > { %v882_v36 = vpack.c.bf16 %v495_v34, %v494_v35 }
  0xfe   : > { %883 = vmatprep.subr.bf16.mxu1 %v882_v36 }
  0xff   : > { %885 = vmatpush3.bf16.msra.mxu1 %v882_v36 }
 0x100   : > { %886 = vmatprep.subr.bf16.mxu1 %v945_v38 }
 0x102   : > { %861 = vmatmul.mubr.msk.f32.vlgmr.msra.gmra.mrb[0].mxu1 %vm510_vm2, %v497_v37 }
 0x103   : > { %867 = vmatprep.mubr.msk.f32.mxu1 %vm946_vm3, %v947_v39 }
 0x1d5   : > { %v862_v41 = vpop.f32.mrb[0].mxu1 }
 0x1d6   : > { %v589_v43 = vadd.f32 %v862_v41, %v508_v40  ;;  %v583_v44 = vpop.f32.mrb[1].mxu1 }
 0x1d7   : > { %v584_v45 = vadd.f32 %v583_v44, %v503_v42 }
 0x1d8   : > { %594 = vst.msk [vmem:[%s349_s22 + $0x8] sm:$0xff] %vm592_vm4, %v589_v43 }
 0x1d9   : > { %593 = vst.msk [vmem:[%s349_s22] sm:$0xff] %vm592_vm4, %v584_v45  ;;  %v887_v46 = vpack.c.bf16 %v589_v43, %v584_v45 }
 0x1db   : > { %888 = vmatpush3.bf16.msra.mxu1 %v887_v46 }
 0x1de   : > { %868 = vmatmul.mubr.msk.f32.vlgmr.msra.gmra.mrb[2].mxu1 %vm597_vm5, %v596_v47 }
 0x2b1   : > { %v667_v49 = vpop.f32.mrb[2].mxu1 }
 0x2b2   : > { %v672_v50 = vmul.f32 %v671_v48, %v667_v49  ;;  %v869_v51 = vpop.f32.mrb[3].mxu1 }
 0x2b4   : > { %673 = vst.msk [vmem:[%s356_s10] sm:$0xff] %vm592_vm4, %v672_v50 }
 0x2b5 PF: > { %s20_s9 = sadd.s32 1, %s942_s9   ;;  %s1094_s29 = smov %s938_s30 }
 0x2b6   : > { %p17_p5 = scmp.ge.s32.totalorder %s20_s9, 4   ;;  %s1095_s30 = smov %s1097_s6 }
 0x2b8   :  { %19 = sbr.rel (!%p17_p5) target bundleno = 2 (0x2), region = 90 }

// kernel: simple_segmentation_model_emb_forward.3
= control target key start
LH: loop header
LB: loop body
LE: loop exit
PB: predicated region body
PF: predicated region fallthrough
CT: control target
= control target key end

     0   :  { %8 = vsyncpa [#allocation3], 0  ;;  %s2141_s0 = inlined_call_operand.vmem [shape: f32[2,8,8,8], index: 0, kind: input, shape index: {}]   ;;  %s2142_s1 = inlined_call_operand.vmem [shape: f32[8,16], index: 1, kind: input, shape index: {}]   ;;  %s2143_s2 = inlined_call_operand.vmem [shape: f32[16,8], index: 2, kind: input, shape index: {}]   ;;  %s2144_s3 = inlined_call_operand.hbm [shape: f32[2,8,16,16], index: 3, kind: output, shape index: {}]  }
   0x1   :  { %10 = vsyncpa [#allocation3 + $0x1], 0  ;;  %s1936_s12 = smov 0   ;;  %s1938_s13 = smov 0  }
   0x2   :  { %s1940_s14 = smov 0   ;;  %s1942_s15 = smov 0  }
   0x3   :  { %s1944_s16 = smov 0   ;;  %s1946_s17 = smov 0  }
   0x4 LB: > { %s1592_s18 = sadd.s32 4294967295, %s1909_s17   ;;  %s1593_s19 = sadd.s32 4294967294, %s1909_s17   ;;  %s1909_s17 = sphi %s1946_s17, %s16_s17   ;;  %s1905_s16 = sphi %s1944_s16, %s2151_s16   ;;  %s1901_s15 = sphi %s1942_s15, %s2150_s15   ;;  %s1897_s14 = sphi %s1940_s14, %s2149_s14   ;;  %s1893_s13 = sphi %s1938_s13, %s2148_s13   ;;  %s1889_s12 = sphi %s1936_s12, %s2147_s12  }
   0x5   : > { %s28_s20 = sadd.s32 1, %s1905_s16  ;;  %s107_s21 = sadd.s32 1, %s1897_s14 }
   0x6   : > { %p30_p0 = scmp.ge.s32.totalorder %s28_s20, 2  ;;  %p117_p1 = scmp.ne.s32.totalorder %s1897_s14, %s1893_s13 }
   0x7   : > { %p118_p2 = scmp.eq.s32.totalorder %s1592_s18, 1  ;;  %p123_p3 = scmp.ne.s32.totalorder %s1893_s13, %s1889_s12 }
   0x8   : > { %s2153_s20 = smov (%p30_p0, %s28_s20), 0  ;;  %p124_p5 = scmp.eq.s32.totalorder %s1593_s19, 1 }
   0x9   : > { %p1976_p4 = por %p118_p2, %p117_p1  ;;  %s102_s23 = ssub.s32 %s1905_s16, %s2153_s20 }
   0xa   : > { %p1596_p6 = scmp.ge.s32.totalorder %s1909_s17, 1  ;;  %p105_p7 = scmp.eq.s32.totalorder %s102_s23, 0 }
   0xb   : > { %p1983_p8 = por %p124_p5, %p123_p3  ;;  %p161_p9 = scmp.lt.s32.totalorder %s1909_s17, 3 }
   0xc   : > { %s1989_s25 = scalar_select %p105_p7, %s1897_s14, %s107_s21  }
   0xd   : > { %p162_p10 = pnand %p1596_p6, %p161_p9 }
   0xe   : > { %v201_v0 = vld [vmem:[%s2142_s1] sm:$0xff] (!%p162_p10)  ;;  %p190_p11 = scmp.lt.s32.totalorder (!%p162_p10), %s1901_s15, 1  ;;  %v1911_v1 = vmov (!%p162_p10), 0.0   ;;  %vm1912_vm0 = vmmov (!%p162_p10), 0   ;;  %vm202_vm1 = vcmask (!%p162_p10), 64512   ;;  %v277_v12 = vld [vmem:[%s2143_s2 + $0x8] sm:$0xff] (!%p162_p10) }
   0xf   : > { %165 = sbr.rel (%p162_p10) target bundleno = 497 (0x1f1), region = 32  ;;  %1692 = vmatprep.subr.mxu0 (!%p162_p10), %v1911_v1  ;;  %1694 = vmatprep.mubr.msk.f32.mxu0 (!%p162_p10), %vm1912_vm0, %v1911_v1  ;;  %v276_v10 = vld [vmem:[%s2143_s2] sm:$0xff] (!%p162_p10)  ;;  %s186_s10 = sand.u32 (!%p162_p10), 1, %s1893_s13   ;;  %vm359_vm2 = vcmask (!%p162_p10), 130048  }
  0x10   : > { %1693 = vmatpush3.msra.mxu0 (!%p162_p10), %v201_v0  ;;  %1699 = vmatprep.mubr.msk.f32.mxu1 (!%p162_p10), %vm202_vm1, %v276_v10  ;;  %s1597_s11 = sshll.u32 (!%p162_p10), %s186_s10, 7  ;;  %s1651_s19 = sshll.u32 (!%p162_p10), %s1901_s15, 11 }
  0x11   : > { %1702 = vmatprep.subr.mxu0 (!%p162_p10), %v1911_v1  ;;  %s2050_s18 = scalar_lea.vmem (!%p162_p10), [#allocation2], %s1597_s11  ;;  %s2085_s27 = scalar_lea.hbm (!%p162_p10), %s2144_s3, %s1651_s19 }
  0x12   : > { %s1513_s21 = sshll.u32 (!%p162_p10), %s2050_s18, 4  ;;  %s2087_s21 = int_to_ptr.vmem [resolvable:$true] %s1513_s21 }
  0x16   : > { %s191_s28 = scalar_select %p190_p11, %s1901_s15, 1 }
  0x17   : > { %s2095_s15 = scalar_lea.sflag [#allocation3], %s186_s10 }
  0x18   : > { %s1650_s29 = sshll.u32 %s191_s28, 6  ;;  %s1831_s28 = scalar_lea.vmem %s2087_s21, 2048 }
  0x19   : > { %s2000_s5 = scalar_lea.vmem %s2141_s0, %s1650_s29  ;;  %p1832_p12 = scmp.ne.s32.totalorder %s2087_s21, %s1831_s28 }
  0x1a   : > { %v200_v2 = vld [vmem:[%s2000_s5] sm:$0xff]  ;;  %v1603_v3 = vld [vmem:[%s2000_s5 + $0x8] sm:$0xff]  ;;  %v1609_v4 = vld [vmem:[%s2000_s5 + $0x10] sm:$0xff]  ;;  %s1913_s29 = smov [#allocation2]  }
  0x1b   : > { %1695 = vmatmul.mubr.msk.f32.vlgmr.msra.gmra.mrb[0].mxu0 %vm202_vm1, %v200_v2  ;;  %v1615_v5 = vld [vmem:[%s2000_s5 + $0x18] sm:$0xff]  ;;  %v1621_v6 = vld [vmem:[%s2000_s5 + $0x20] sm:$0xff]  ;;  %v1627_v7 = vld [vmem:[%s2000_s5 + $0x28] sm:$0xff]  ;;  %p1833_p13 = pnand %p1832_p12, %p1976_p4  ;;  %s1835_s30 = sshll.u32 %s1913_s29, 4  ;;  %s1836_s30 = int_to_ptr.vmem [resolvable:$false] %s1835_s30 }
  0x1c   : > { %1703 = vmatpush3.msra.mxu0 %v201_v0  ;;  %1704 = vmatprep.mubr.msk.f32.mxu0 %vm1912_vm0, %v1911_v1  ;;  %v1633_v8 = vld [vmem:[%s2000_s5 + $0x30] sm:$0xff]  ;;  %v1639_v9 = vld [vmem:[%s2000_s5 + $0x38] sm:$0xff]  ;;  %s1837_s4 = scalar_lea.vmem %s1836_s30, 4096  ;;  %p1838_p1 = scmp.lt.s32.totalorder %s2087_s21, %s1836_s30 }
  0x1d   : > { %1712 = vmatprep.subr.mxu0 %v1911_v1  ;;  %p1834_p0 = pneg %p1833_p13  ;;  %p1839_p2 = scmp.lt.s32.totalorder %s1837_s4, %s1831_s28 }
  0x1f   : > { %1705 = vmatmul.mubr.msk.f32.vlgmr.msra.gmra.mrb[2].mxu0 %vm202_vm1, %v1603_v3  ;;  %p1840_p3 = por %p1839_p2, %p1838_p1 }
  0x20   : > { %1713 = vmatpush3.msra.mxu0 %v201_v0  ;;  %1714 = vmatprep.mubr.msk.f32.mxu0 %vm1912_vm0, %v1911_v1 }
  0x21   : > { %1722 = vmatprep.subr.mxu0 %v1911_v1  ;;  %p1841_p5 = pnand %p1840_p3, %p1834_p0 }
  0x23   : > { %1715 = vmatmul.mubr.msk.f32.vlgmr.msra.gmra.mrb[4].mxu0 %vm202_vm1, %v1609_v4 }
  0x24   : > { %1723 = vmatpush3.msra.mxu0 %v201_v0  ;;  %1724 = vmatprep.mubr.msk.f32.mxu0 %vm1912_vm0, %v1911_v1 }
  0x25   : > { %1732 = vmatprep.subr.mxu0 %v1911_v1 }
  0x27   : > { %1725 = vmatmul.mubr.msk.f32.vlgmr.msra.gmra.mrb[6].mxu0 %vm202_vm1, %v1615_v5 }
  0x28   : > { %1733 = vmatpush3.msra.mxu0 %v201_v0  ;;  %1734 = vmatprep.mubr.msk.f32.mxu0 %vm1912_vm0, %v1911_v1 }
  0x29   : > { %1742 = vmatprep.subr.mxu0 %v1911_v1 }
  0x2b   : > { %1735 = vmatmul.mubr.msk.f32.vlgmr.msra.gmra.mrb[8].mxu0 %vm202_vm1, %v1621_v6 }
  0x2c   : > { %1743 = vmatpush3.msra.mxu0 %v201_v0  ;;  %1744 = vmatprep.mubr.msk.f32.mxu0 %vm1912_vm0, %v1911_v1 }
  0x2d   : > { %1752 = vmatprep.subr.mxu0 %v1911_v1 }
  0x2f   : > { %1745 = vmatmul.mubr.msk.f32.vlgmr.msra.gmra.mrb[10].mxu0 %vm202_vm1, %v1627_v7 }
  0x30   : > { %1753 = vmatpush3.msra.mxu0 %v201_v0  ;;  %1754 = vmatprep.mubr.msk.f32.mxu0 %vm1912_vm0, %v1911_v1 }
  0x31   : > { %1762 = vmatprep.subr.mxu0 %v1911_v1 }
  0x33   : > { %1755 = vmatmul.mubr.msk.f32.vlgmr.msra.gmra.mrb[12].mxu0 %vm202_vm1, %v1633_v8 }
  0x34   : > { %1763 = vmatpush3.msra.mxu0 %v201_v0  ;;  %1764 = vmatprep.mubr.msk.f32.mxu0 %vm1912_vm0, %v1911_v1 }
  0x37   : > { %1765 = vmatmul.mubr.msk.f32.vlgmr.msra.gmra.mrb[14].mxu0 %vm202_vm1, %v1639_v9 }
  0xee   : > { %v272_v11 = vpop.f32.mrb[0].mxu0 }
  0xef   : > { %v1696_v13 = vpop.f32.mrb[1].mxu0  ;;  %1697 = vmatprep.subr.mxu1 %v272_v11 }
  0xf0   : > { %1698 = vmatpush3.msra.mxu1 %v272_v11 }
  0xf1   : > { %1700 = vmatmul.mubr.msk.f32.vlgmr.msra.gmra.mrb[0].mxu1 %vm202_vm1, %v277_v12 }
  0xf2   : > { %v434_v14 = vpop.f32.mrb[2].mxu0  ;;  %1709 = vmatprep.mubr.msk.f32.mxu1 %vm202_vm1, %v276_v10 }
  0xf3   : > { %v1706_v15 = vpop.f32.mrb[3].mxu0  ;;  %1707 = vmatprep.subr.mxu1 %v434_v14 }
  0xf4   : > { %1708 = vmatpush3.msra.mxu1 %v434_v14 }
  0xf5   : > { %1710 = vmatmul.mubr.msk.f32.vlgmr.msra.gmra.mrb[2].mxu1 %vm202_vm1, %v277_v12 }
  0xf6   : > { %v596_v16 = vpop.f32.mrb[4].mxu0  ;;  %1719 = vmatprep.mubr.msk.f32.mxu1 %vm202_vm1, %v276_v10 }
  0xf7   : > { %v1716_v17 = vpop.f32.mrb[5].mxu0  ;;  %1717 = vmatprep.subr.mxu1 %v596_v16 }
  0xf8   : > { %1718 = vmatpush3.msra.mxu1 %v596_v16 }
  0xf9   : > { %1720 = vmatmul.mubr.msk.f32.vlgmr.msra.gmra.mrb[4].mxu1 %vm202_vm1, %v277_v12 }
  0xfa   : > { %v758_v18 = vpop.f32.mrb[6].mxu0  ;;  %1729 = vmatprep.mubr.msk.f32.mxu1 %vm202_vm1, %v276_v10 }
  0xfb   : > { %v1726_v19 = vpop.f32.mrb[7].mxu0  ;;  %1727 = vmatprep.subr.mxu1 %v758_v18 }
  0xfc   : > { %1728 = vmatpush3.msra.mxu1 %v758_v18 }
  0xfd   : > { %1730 = vmatmul.mubr.msk.f32.vlgmr.msra.gmra.mrb[6].mxu1 %vm202_vm1, %v277_v12 }
  0xfe   : > { %v920_v20 = vpop.f32.mrb[8].mxu0  ;;  %1739 = vmatprep.mubr.msk.f32.mxu1 %vm202_vm1, %v276_v10 }
  0xff   : > { %v1736_v21 = vpop.f32.mrb[9].mxu0  ;;  %1737 = vmatprep.subr.mxu1 %v920_v20 }
 0x100   : > { %1738 = vmatpush3.msra.mxu1 %v920_v20 }
 0x101   : > { %1740 = vmatmul.mubr.msk.f32.vlgmr.msra.gmra.mrb[8].mxu1 %vm202_vm1, %v277_v12 }
 0x102   : > { %v1082_v22 = vpop.f32.mrb[10].mxu0  ;;  %1749 = vmatprep.mubr.msk.f32.mxu1 %vm202_vm1, %v276_v10 }
 0x103   : > { %v1746_v23 = vpop.f32.mrb[11].mxu0  ;;  %1747 = vmatprep.subr.mxu1 %v1082_v22 }
 0x104   : > { %1748 = vmatpush3.msra.mxu1 %v1082_v22 }
 0x105   : > { %1750 = vmatmul.mubr.msk.f32.vlgmr.msra.gmra.mrb[10].mxu1 %vm202_vm1, %v277_v12 }
 0x106   : > { %v1244_v24 = vpop.f32.mrb[12].mxu0  ;;  %1759 = vmatprep.mubr.msk.f32.mxu1 %vm202_vm1, %v276_v10 }
 0x107   : > { %v1756_v25 = vpop.f32.mrb[13].mxu0  ;;  %1757 = vmatprep.subr.mxu1 %v1244_v24 }
 0x108   : > { %1758 = vmatpush3.msra.mxu1 %v1244_v24 }
 0x109   : > { %1760 = vmatmul.mubr.msk.f32.vlgmr.msra.gmra.mrb[12].mxu1 %vm202_vm1, %v277_v12 }
 0x10a   : > { %v1406_v26 = vpop.f32.mrb[14].mxu0  ;;  %1769 = vmatprep.mubr.msk.f32.mxu1 %vm202_vm1, %v276_v10 }
 0x10b   : > { %v1766_v27 = vpop.f32.mrb[15].mxu0  ;;  %1767 = vmatprep.subr.mxu1 %v1406_v26 }
 0x10c   : > { %1768 = vmatpush3.msra.mxu1 %v1406_v26 }
 0x10d   : > { %1770 = vmatmul.mubr.msk.f32.vlgmr.msra.gmra.mrb[14].mxu1 %vm202_vm1, %v277_v12 }
 0x1c4   : > { %v1701_v28 = vpop.f32.mrb[0].mxu1 }
 0x1c5   : > { %361 = vst.msk [vmem:[%s2050_s18 + $0x8] sm:$0xff] %vm359_vm2, %v1701_v28  ;;  %v350_v29 = vpop.f32.mrb[1].mxu1 }
 0x1c6   : > { %360 = vst.msk [vmem:[%s2050_s18] sm:$0xff] %vm359_vm2, %v350_v29 }
 0x1c8   : > { %v1711_v30 = vpop.f32.mrb[2].mxu1 }
 0x1c9   : > { %1608 = vst.msk [vmem:[%s2050_s18 + $0x18] sm:$0xff] %vm359_vm2, %v1711_v30  ;;  %v512_v31 = vpop.f32.mrb[3].mxu1 }
 0x1ca   : > { %1607 = vst.msk [vmem:[%s2050_s18 + $0x10] sm:$0xff] %vm359_vm2, %v512_v31 }
 0x1cc   : > { %v1721_v32 = vpop.f32.mrb[4].mxu1 }
 0x1cd   : > { %1614 = vst.msk [vmem:[%s2050_s18 + $0x28] sm:$0xff] %vm359_vm2, %v1721_v32  ;;  %v674_v33 = vpop.f32.mrb[5].mxu1 }
 0x1ce   : > { %1613 = vst.msk [vmem:[%s2050_s18 + $0x20] sm:$0xff] %vm359_vm2, %v674_v33 }
 0x1d0   : > { %v1731_v34 = vpop.f32.mrb[6].mxu1 }
 0x1d1   : > { %1620 = vst.msk [vmem:[%s2050_s18 + $0x38] sm:$0xff] %vm359_vm2, %v1731_v34  ;;  %v836_v35 = vpop.f32.mrb[7].mxu1 }
 0x1d2   : > { %1619 = vst.msk [vmem:[%s2050_s18 + $0x30] sm:$0xff] %vm359_vm2, %v836_v35 }
 0x1d4   : > { %v1741_v36 = vpop.f32.mrb[8].mxu1 }
 0x1d5   : > { %1626 = vst.msk [vmem:[%s2050_s18 + $0x48] sm:$0xff] %vm359_vm2, %v1741_v36  ;;  %v998_v37 = vpop.f32.mrb[9].mxu1 }
 0x1d6   : > { %1625 = vst.msk [vmem:[%s2050_s18 + $0x40] sm:$0xff] %vm359_vm2, %v998_v37 }
 0x1d8   : > { %v1751_v38 = vpop.f32.mrb[10].mxu1 }
 0x1d9   : > { %1632 = vst.msk [vmem:[%s2050_s18 + $0x58] sm:$0xff] %vm359_vm2, %v1751_v38  ;;  %v1160_v39 = vpop.f32.mrb[11].mxu1 }
 0x1da   : > { %1631 = vst.msk [vmem:[%s2050_s18 + $0x50] sm:$0xff] %vm359_vm2, %v1160_v39 }
 0x1dc   : > { %v1761_v40 = vpop.f32.mrb[12].mxu1 }
 0x1dd   : > { %1638 = vst.msk [vmem:[%s2050_s18 + $0x68] sm:$0xff] %vm359_vm2, %v1761_v40  ;;  %v1322_v41 = vpop.f32.mrb[13].mxu1 }
 0x1de   : > { %1637 = vst.msk [vmem:[%s2050_s18 + $0x60] sm:$0xff] %vm359_vm2, %v1322_v41 }
 0x1e0   : > { %v1771_v42 = vpop.f32.mrb[14].mxu1 }
 0x1e1   : > { %1644 = vst.msk [vmem:[%s2050_s18 + $0x78] sm:$0xff] %vm359_vm2, %v1771_v42  ;;  %v1484_v43 = vpop.f32.mrb[15].mxu1 }
 0x1e2   : > { %1643 = vst.msk [vmem:[%s2050_s18 + $0x70] sm:$0xff] %vm359_vm2, %v1484_v43 }
 0x1e3   : > { %1844 = shalt.err (!%p1841_p5)
}
 0x1e4   : > { %s1845_s5 = scalar_lea.hbm %s2085_s27, 2048  ;;  %s1849_s8 = scalar_lea.hbm %s2144_s3, 4096 }
 0x1e5   : > { %p1846_p6 = scmp.ne.s32.totalorder %s2085_s27, %s1845_s5  ;;  %p1850_p10 = scmp.lt.u32.totalorder %s2085_s27, %s2144_s3 }
 0x1e6   : > { %p1851_p11 = scmp.lt.u32.totalorder %s1849_s8, %s1845_s5  ;;  %p1853_p13 = scmp.lt.u32.totalorder %s1845_s5, %s2085_s27 }
 0x1e7   : > { %p1847_p7 = pnand %p1846_p6, %p1976_p4 }
 0x1e8   : > { %p1852_p12 = por %p1851_p11, %p1850_p10 }
 0x1e9   : > { %p1848_p9 = pneg %p1847_p7 }
 0x1ea   : > { %p1854_p0 = por %p1853_p13, %p1852_p12 }
 0x1ec   : > { %p1855_p1 = pnand %p1854_p0, %p1848_p9 }
 0x1ee   : > { %1858 = shalt.err (!%p1855_p1)
}
 0x1ef   : > { %s1914_s11 = smov 128   ;;  %s1915_s18 = smov 8  }
 0x1f0   : > { %1772 = dma.vmem_to_hbm [thread:$0]  (%p1976_p4), %s2087_s21, 2048, %s2085_s27, %s2095_s15, %s1914_s11, %s1914_s11, %s1915_s18  }
 0x1f1 PF: > { %p1778_p2 = scmp.ge.s32.totalorder %s1909_s17, 2  ;;  %s1528_s19 = sand.u32 1, %s1889_s12  }
 0x1f2   : > { %s1529_s23 = scalar_lea.sflag [#allocation3], %s1528_s19 }
 0x1f3   : > { %p1775_p3 = pnand %p1778_p2, %p1983_p8 }
 0x1f5   : > { %1884 = dma.done.wait (!%p1775_p3), %s1529_s23, 2048  }
 0x1f6   : > { %1886 = vsyncadd (!%p1775_p3), %s1529_s23, 4294965248  ;;  %s16_s17 = sadd.s32 1, %s1909_s17   ;;  %s2147_s12 = smov %s1893_s13 }
 0x1f7   : > { %p13_p5 = scmp.ge.s32.totalorder %s16_s17, 4   ;;  %s2148_s13 = smov %s1897_s14 }
 0x1f8   : > { %s2149_s14 = smov %s1989_s25  ;;  %s2150_s15 = smov %s1905_s16 }
 0x1f9   : > { %s2151_s16 = smov %s2153_s20  ;;  %15 = sbr.rel (!%p13_p5) target bundleno = 4 (0x4), region = 81 }
 0x200   :  { %1534 = vsyncpa [#allocation3], 1 }
 0x201   :  { %1536 = vsyncpa [#allocation3 + $0x1], 1 }

</bundles_post_ra>
